<compile_context>
chip_gen: v7x
topology: tpu7x:2x2x1
jax: 0.10.0
libtpu: 0.0.40
codegen_flags: <defaults>
</compile_context>

<pallas_src>
import jax
import jax.numpy as jnp
from jax import lax
from jax.experimental import pallas as pl
from jax.experimental.pallas import tpu as pltpu


def _integrator_kernel(q_ref, fcw_ref, fcb_ref, x_ref, convw_ref, convb_ref,
                       qo_ref, mo_ref):
    # --- fc: batched [B, Qh] x [F, Qh]^T -> [B, F] (single MXU matmul). ---
    q = lax.dot_general(
        q_ref[...], fcw_ref[...],
        dimension_numbers=(((1,), (1,)), ((), ())),
        preferred_element_type=jnp.float32)
    qo_ref[...] = (q + fcb_ref[...]).astype(qo_ref.dtype)

    # --- 1x1 conv on this lane-dense H*W tile: per batch,
    #     [C_out, C_in] @ [C_in, THW] + [C_out, 1]. ---
    w = convw_ref[...]
    bias = convb_ref[...]
    for b in range(x_ref.shape[0]):        # static unroll over (small) batch
        m = jnp.dot(w, x_ref[b], preferred_element_type=jnp.float32)
        mo_ref[b] = (m + bias).astype(mo_ref.dtype)


def _const_spec(block_shape):
    """BlockSpec for a block whose index never changes (weights / bias / queries)."""
    n = len(block_shape)
    index_map = lambda j, _n=n: (0,) * _n
    try:
        # Single-buffered: the block is grid-invariant, double-buffering it
        # only wastes VMEM.
        return pl.BlockSpec(block_shape, index_map, pipeline_mode=pl.Buffered(1))
    except (AttributeError, TypeError, ValueError):
        # Older/newer API without pipeline_mode / Buffered: fall back.
        return pl.BlockSpec(block_shape, index_map)


def _choose_hw_tile(HW, B, C, itemsize, max_block_bytes=4 * 1024 * 1024):
    """Pick a lane-aligned H*W tile: multiple of 128, divides HW, keeps the
    (B, C, THW) block under ~4 MiB, and prefers >= 2 grid steps (v7x megacore)."""
    if HW % 128 != 0:
        # Full-extent trailing block is still legal (stores become masked).
        return HW
    cap = max(128, (max_block_bytes // max(1, B * C * itemsize)) // 128 * 128)
    cands = [t for t in range(128, HW + 1, 128) if HW % t == 0 and t <= cap]
    if not cands:
        return 128
    multi = [t for t in cands if HW // t >= 2]
    return max(multi) if multi else max(cands)


def _integrator_forward(queries, map2d, fc_w, fc_b, conv_w, conv_b):
    """queries: [B, Qh]; map2d: [B, C, H, W] (NCHW).
    fc_w: [F, Qh], fc_b: [F], conv_w: [F, F, 1, 1], conv_b: [F].
    Returns (q: [B, F, 1, 1], m: [B, F, H, W])."""
    B, Qh = queries.shape
    Bm, C, H, W = map2d.shape
    assert B == Bm
    F = fc_w.shape[0]
    HW = H * W

    # Free reshapes only (no transposes, no data movement).
    x_in = map2d.reshape(B, C, HW)
    b_fc = fc_b.reshape(1, F)
    w_cv = conv_w.reshape(C, C)            # [C_out, C_in]
    b_cv = conv_b.reshape(C, 1)

    itemsize = map2d.dtype.itemsize
    thw = _choose_hw_tile(HW, B, C, itemsize)
    n_hw = HW // thw if HW % thw == 0 else 1
    if n_hw < 1:
        n_hw, thw = 1, HW

    # VMEM budget: double-buffered map2d in + out blocks, single-buffered
    # weights, tiny fc tensors.  Only raise the scoped limit when needed.
    blk_bytes = B * C * thw * itemsize
    weight_bytes = (fc_w.size * fc_w.dtype.itemsize
                    + w_cv.size * w_cv.dtype.itemsize
                    + b_fc.size * b_fc.dtype.itemsize
                    + b_cv.size * b_cv.dtype.itemsize
                    + queries.size * queries.dtype.itemsize)
    est = 4 * blk_bytes + weight_bytes + 4 * B * F * queries.dtype.itemsize
    if est > 12 * 1024 * 1024:
        compiler_params = pltpu.CompilerParams(
            dimension_semantics=("parallel",),
            vmem_limit_bytes=min(int(est * 3 // 2), 64 * 1024 * 1024))
    else:
        compiler_params = pltpu.CompilerParams(
            dimension_semantics=("parallel",))

    q_dup, m_out = pl.pallas_call(
        _integrator_kernel,
        out_shape=(
            # fc result duplicated per grid step so every output block index
            # depends on the parallel axis (megacore-safe); wrapper reads [0].
            jax.ShapeDtypeStruct((n_hw, B, F), queries.dtype),
            jax.ShapeDtypeStruct((B, C, HW), map2d.dtype),
        ),
        grid=(n_hw,),
        in_specs=[
            _const_spec((B, Qh)),                               # queries (full)
            _const_spec((F, Qh)),                               # fc weight (PyTorch layout)
            _const_spec((1, F)),                                # fc bias
            pl.BlockSpec((B, C, thw), lambda j: (0, 0, j)),     # map2d HW tile
            _const_spec((C, C)),                                # conv weight
            _const_spec((C, 1)),                                # conv bias
        ],
        out_specs=(
            pl.BlockSpec((None, B, F), lambda j: (j, 0, 0)),    # fc out (per-step slot)
            pl.BlockSpec((B, C, thw), lambda j: (0, 0, j)),     # conv out HW tile
        ),
        compiler_params=compiler_params,
    )(queries, fc_w, b_fc, x_in, w_cv, b_cv)

    # Free reshapes back to the PyTorch output shapes.
    return q_dup[0].reshape(B, F, 1, 1), m_out.reshape(B, C, H, W)


_integrator_forward_jit = jax.jit(_integrator_forward)


class IntegratorPallas:
    """JAX/Pallas port of the PyTorch Integrator module."""

    def __init__(self, feat_hidden_size, query_input_size, query_hidden_size,
                 bidirectional, num_layers, key):
        if bidirectional:
            query_hidden_size //= 2
        self.feat_hidden_size = feat_hidden_size
        self.query_hidden_size = query_hidden_size

        k1, k2, k3, k4 = jax.random.split(key, 4)
        # nn.Linear(query_hidden_size, feat_hidden_size): weight [F, Qh], bias [F]
        self.fc_w = jax.random.normal(
            k1, (feat_hidden_size, query_hidden_size), jnp.float32) * 0.02
        self.fc_b = jax.random.normal(k2, (feat_hidden_size,), jnp.float32) * 0.02
        # nn.Conv2d(F, F, 1, 1): weight [F, F, 1, 1], bias [F]
        self.conv_w = jax.random.normal(
            k3, (feat_hidden_size, feat_hidden_size, 1, 1), jnp.float32) * 0.02
        self.conv_b = jax.random.normal(k4, (feat_hidden_size,), jnp.float32) * 0.02

    def __call__(self, queries, wordlens, map2d):
        # wordlens is unused, matching the PyTorch forward.
        del wordlens
        return _integrator_forward_jit(queries, map2d, self.fc_w, self.fc_b,
                                       self.conv_w, self.conv_b)


if __name__ == "__main__":
    key = jax.random.PRNGKey(0)
    kp, kq, km = jax.random.split(key, 3)

    feat_hidden_size = 32
    query_input_size = 16      # unused by forward, kept for constructor parity
    query_hidden_size = 32
    bidirectional = False
    num_layers = 1

    B, H, W = 2, 16, 16

    model = IntegratorPallas(feat_hidden_size, query_input_size,
                             query_hidden_size, bidirectional, num_layers, kp)

    queries = jax.random.normal(kq, (B, query_hidden_size), jnp.float32)
    wordlens = jnp.array([5, 7], jnp.int32)                        # unused
    map2d = jax.random.normal(km, (B, feat_hidden_size, H, W), jnp.float32)

    q_out, m_out = model(queries, wordlens, map2d)
    jax.block_until_ready((q_out, m_out))

    # Sanity check against a plain-JAX reference.
    q_ref = (queries @ model.fc_w.T + model.fc_b)[:, :, None, None]
    m_ref = (jnp.einsum("bchw,oc->bohw", map2d, model.conv_w[:, :, 0, 0])
             + model.conv_b[None, :, None, None])
    assert q_out.shape == (B, feat_hidden_size, 1, 1)
    assert m_out.shape == (B, feat_hidden_size, H, W)
    assert jnp.allclose(q_out, q_ref, atol=1e-5)
    assert jnp.allclose(m_out, m_ref, atol=1e-5)

    print("KERNEL_OK")
</pallas_src>

<mosaic_0001>
module attributes {stable_mosaic.version = 11 : i64} {
  func.func @_integrator_kernel(%arg0: i32, %arg1: memref<2x32xf32, #tpu.memory_space<vmem>>, %arg2: memref<32x32xf32, #tpu.memory_space<vmem>>, %arg3: memref<1x32xf32, #tpu.memory_space<vmem>>, %arg4: memref<2x32x128xf32, #tpu.memory_space<vmem>>, %arg5: memref<32x32xf32, #tpu.memory_space<vmem>>, %arg6: memref<32x1xf32, #tpu.memory_space<vmem>>, %arg7: memref<1x2x32xf32, #tpu.memory_space<vmem>>, %arg8: memref<2x32x128xf32, #tpu.memory_space<vmem>>) attributes {dimension_semantics = [#tpu.dimension_semantics<parallel>], iteration_bounds = array<i64: 2>, scalar_prefetch = 0 : i64, scratch_operands = 0 : i64, tpu.core_type = #tpu.core_type<tc>, window_params = [{pipeline_mode = #tpu.pipeline_mode<synchronous>, transform_indices = @transform_0, window_bounds = array<i64: 2, 32>}, {pipeline_mode = #tpu.pipeline_mode<synchronous>, transform_indices = @transform_1, window_bounds = array<i64: 32, 32>}, {pipeline_mode = #tpu.pipeline_mode<synchronous>, transform_indices = @transform_2, window_bounds = array<i64: 1, 32>}, {transform_indices = @transform_3, window_bounds = array<i64: 2, 32, 128>}, {pipeline_mode = #tpu.pipeline_mode<synchronous>, transform_indices = @transform_4, window_bounds = array<i64: 32, 32>}, {pipeline_mode = #tpu.pipeline_mode<synchronous>, transform_indices = @transform_5, window_bounds = array<i64: 32, 1>}, {transform_indices = @transform_6, window_bounds = array<i64: 1, 2, 32>}, {transform_indices = @transform_7, window_bounds = array<i64: 2, 32, 128>}]} {
    %c0 = arith.constant 0 : index
    %c0_0 = arith.constant 0 : index
    %0 = vector.load %arg1[%c0, %c0_0] : memref<2x32xf32, #tpu.memory_space<vmem>>, vector<2x32xf32>
    %c0_1 = arith.constant 0 : index
    %c0_2 = arith.constant 0 : index
    %1 = vector.load %arg2[%c0_1, %c0_2] : memref<32x32xf32, #tpu.memory_space<vmem>>, vector<32x32xf32>
    %cst = arith.constant dense<0.000000e+00> : vector<2x32xf32>
    %2 = tpu.matmul %0, %1, %cst {dimension_numbers = #tpu.dot_dimension_numbers<[1], [1], [0], [0], [0, 0, 1, 0], [], []>} : vector<2x32xf32>, vector<32x32xf32>, vector<2x32xf32> -> vector<2x32xf32>
    %c0_3 = arith.constant 0 : index
    %c0_4 = arith.constant 0 : index
    %3 = vector.load %arg3[%c0_3, %c0_4] : memref<1x32xf32, #tpu.memory_space<vmem>>, vector<1x32xf32>
    %4 = vector.broadcast %3 : vector<1x32xf32> to vector<2x32xf32>
    %5 = arith.addf %2, %4 : vector<2x32xf32>
    %c0_5 = arith.constant 0 : index
    %c0_6 = arith.constant 0 : index
    %c0_7 = arith.constant 0 : index
    %6 = vector.load %arg7[%c0_5, %c0_6, %c0_7] : memref<1x2x32xf32, #tpu.memory_space<vmem>>, vector<1x2x32xf32>
    %7 = vector.shape_cast %6 : vector<1x2x32xf32> to vector<2x32xf32>
    %8 = vector.shape_cast %5 : vector<2x32xf32> to vector<1x2x32xf32>
    tpu.vector_store %arg7[%c0_5, %c0_6, %c0_7], %8 {strides = array<i32>} : memref<1x2x32xf32, #tpu.memory_space<vmem>>, vector<1x2x32xf32>,
    %c0_8 = arith.constant 0 : index
    %c0_9 = arith.constant 0 : index
    %9 = vector.load %arg5[%c0_8, %c0_9] : memref<32x32xf32, #tpu.memory_space<vmem>>, vector<32x32xf32>
    %c0_10 = arith.constant 0 : index
    %c0_11 = arith.constant 0 : index
    %10 = vector.load %arg6[%c0_10, %c0_11] : memref<32x1xf32, #tpu.memory_space<vmem>>, vector<32x1xf32>
    %c0_12 = arith.constant 0 : index
    %c0_13 = arith.constant 0 : index
    %c0_14 = arith.constant 0 : index
    %11 = vector.load %arg4[%c0_12, %c0_13, %c0_14] : memref<2x32x128xf32, #tpu.memory_space<vmem>>, vector<1x32x128xf32>
    %12 = vector.shape_cast %11 : vector<1x32x128xf32> to vector<32x128xf32>
    %cst_15 = arith.constant dense<0.000000e+00> : vector<32x128xf32>
    %13 = tpu.matmul %9, %12, %cst_15 {dimension_numbers = #tpu.dot_dimension_numbers<[1], [0], [0], [1], [0, 0, 1, 1], [], []>} : vector<32x32xf32>, vector<32x128xf32>, vector<32x128xf32> -> vector<32x128xf32>
    %14 = vector.broadcast %10 : vector<32x1xf32> to vector<32x128xf32>
    %15 = arith.addf %13, %14 : vector<32x128xf32>
    %c0_16 = arith.constant 0 : index
    %c0_17 = arith.constant 0 : index
    %c0_18 = arith.constant 0 : index
    %16 = vector.load %arg8[%c0_16, %c0_17, %c0_18] : memref<2x32x128xf32, #tpu.memory_space<vmem>>, vector<1x32x128xf32>
    %17 = vector.shape_cast %16 : vector<1x32x128xf32> to vector<32x128xf32>
    %18 = vector.shape_cast %15 : vector<32x128xf32> to vector<1x32x128xf32>
    tpu.vector_store %arg8[%c0_16, %c0_17, %c0_18], %18 {strides = array<i32>} : memref<2x32x128xf32, #tpu.memory_space<vmem>>, vector<1x32x128xf32>,
    %c1 = arith.constant 1 : index
    %c0_19 = arith.constant 0 : index
    %c0_20 = arith.constant 0 : index
    %19 = vector.load %arg4[%c1, %c0_19, %c0_20] : memref<2x32x128xf32, #tpu.memory_space<vmem>>, vector<1x32x128xf32>
    %20 = vector.shape_cast %19 : vector<1x32x128xf32> to vector<32x128xf32>
    %cst_21 = arith.constant dense<0.000000e+00> : vector<32x128xf32>
    %21 = tpu.matmul %9, %20, %cst_21 {dimension_numbers = #tpu.dot_dimension_numbers<[1], [0], [0], [1], [0, 0, 1, 1], [], []>} : vector<32x32xf32>, vector<32x128xf32>, vector<32x128xf32> -> vector<32x128xf32>
    %22 = vector.broadcast %10 : vector<32x1xf32> to vector<32x128xf32>
    %23 = arith.addf %21, %22 : vector<32x128xf32>
    %c1_22 = arith.constant 1 : index
    %c0_23 = arith.constant 0 : index
    %c0_24 = arith.constant 0 : index
    %24 = vector.load %arg8[%c1_22, %c0_23, %c0_24] : memref<2x32x128xf32, #tpu.memory_space<vmem>>, vector<1x32x128xf32>
    %25 = vector.shape_cast %24 : vector<1x32x128xf32> to vector<32x128xf32>
    %26 = vector.shape_cast %23 : vector<32x128xf32> to vector<1x32x128xf32>
    tpu.vector_store %arg8[%c1_22, %c0_23, %c0_24], %26 {strides = array<i32>} : memref<2x32x128xf32, #tpu.memory_space<vmem>>, vector<1x32x128xf32>,
    return
  }
  func.func @transform_0(%arg0: i32) -> (i32, i32) {
    %c0_i32 = arith.constant 0 : i32
    %c0_i32_0 = arith.constant 0 : i32
    %c0_i32_1 = arith.constant 0 : i32
    return %c0_i32, %c0_i32_0 : i32, i32
  }
  func.func @transform_1(%arg0: i32) -> (i32, i32) {
    %c0_i32 = arith.constant 0 : i32
    %c0_i32_0 = arith.constant 0 : i32
    %c0_i32_1 = arith.constant 0 : i32
    return %c0_i32, %c0_i32_0 : i32, i32
  }
  func.func @transform_2(%arg0: i32) -> (i32, i32) {
    %c0_i32 = arith.constant 0 : i32
    %c0_i32_0 = arith.constant 0 : i32
    %c0_i32_1 = arith.constant 0 : i32
    return %c0_i32, %c0_i32_0 : i32, i32
  }
  func.func @transform_3(%arg0: i32) -> (i32, i32, i32) {
    %c0_i32 = arith.constant 0 : i32
    %c0_i32_0 = arith.constant 0 : i32
    %c0_i32_1 = arith.constant 0 : i32
    return %c0_i32, %c0_i32_0, %arg0 : i32, i32, i32
  }
  func.func @transform_4(%arg0: i32) -> (i32, i32) {
    %c0_i32 = arith.constant 0 : i32
    %c0_i32_0 = arith.constant 0 : i32
    %c0_i32_1 = arith.constant 0 : i32
    return %c0_i32, %c0_i32_0 : i32, i32
  }
  func.func @transform_5(%arg0: i32) -> (i32, i32) {
    %c0_i32 = arith.constant 0 : i32
    %c0_i32_0 = arith.constant 0 : i32
    %c0_i32_1 = arith.constant 0 : i32
    return %c0_i32, %c0_i32_0 : i32, i32
  }
  func.func @transform_6(%arg0: i32) -> (i32, i32, i32) {
    %c0_i32 = arith.constant 0 : i32
    %c0_i32_0 = arith.constant 0 : i32
    %c0_i32_1 = arith.constant 0 : i32
    return %arg0, %c0_i32, %c0_i32_0 : i32, i32, i32
  }
  func.func @transform_7(%arg0: i32) -> (i32, i32, i32) {
    %c0_i32 = arith.constant 0 : i32
    %c0_i32_0 = arith.constant 0 : i32
    %c0_i32_1 = arith.constant 0 : i32
    return %c0_i32, %c0_i32_0, %arg0 : i32, i32, i32
  }
}

</mosaic_0001>

<bundles_post_ra>
// kernel: _integrator_forward.1
= control target key start
LH: loop header
LB: loop body
LE: loop exit
PB: predicated region body
PF: predicated region fallthrough
CT: control target
= control target key end

     0   :  { %s1048_s24 = smov 0   ;;  %s1050_s25 = smov 0   ;;  %s1196_s0 = inlined_call_operand.vmem [shape: f32[2,32], index: 0, kind: input, shape index: {}]   ;;  %s1197_s1 = inlined_call_operand.vmem [shape: f32[32,32], index: 1, kind: input, shape index: {}]   ;;  %s1198_s2 = inlined_call_operand.vmem [shape: f32[1,32], index: 2, kind: input, shape index: {}]   ;;  %s1199_s3 = inlined_call_operand.vmem [shape: f32[2,32,256], index: 3, kind: input, shape index: {}]   ;;  %s1200_s4 = inlined_call_operand.vmem [shape: f32[32,32], index: 4, kind: input, shape index: {}]   ;;  %s1201_s5 = inlined_call_operand.vmem [shape: f32[32,1], index: 5, kind: input, shape index: {}]   ;;  %s1202_s6 = inlined_call_operand.vmem [shape: f32[2,2,32], index: 6, kind: output, shape index: {0}]   ;;  %s1203_s7 = inlined_call_operand.vmem [shape: f32[2,32,256], index: 7, kind: output, shape index: {1}]  }
   0x1   :  { %s1052_s26 = smov 0  }
   0x2 LB: > { %s1064_s27 = sadd.s32 4294967295, %s1002_s26   ;;  %s1067_s28 = sadd.s32 1, %s1002_s26   ;;  %s1002_s26 = sphi %s1052_s26, %s1209_s26   ;;  %s998_s25 = sphi %s1050_s25, %s1208_s25   ;;  %s994_s24 = sphi %s1048_s24, %s1207_s24  }
   0x3   : > { %s85_s29 = ssub.s32 %s1002_s26, %s1067_s28  ;;  %s88_s30 = sadd.s32 1, %s998_s25 }
   0x4   : > { %p86_p0 = scmp.eq.s32.totalorder %s85_s29, 0  ;;  %p95_p1 = scmp.ne.s32.totalorder %s998_s25, %s994_s24 }
   0x5   : > { %p96_p2 = scmp.eq.s32.totalorder %s1002_s26, 0  ;;  %p193_p3 = scmp.eq.s32.totalorder %s1064_s27, 1 }
   0x6   : > { %s1077_s8 = scalar_select %p86_p0, %s998_s25, %s88_s30  }
   0x7   : > { %p97_p4 = por %p96_p2, %p95_p1  ;;  %p1079_p5 = por %p193_p3, %p95_p1 }
   0x8   : > { %p833_p6 = scmp.ge.s32.totalorder %s1002_s26, 2 }
   0xa   : > { %230 = sbr.rel (%p833_p6) target bundleno = 25 (0x19), region = 36 }
  0x11   : > { %233 = sbr.rel (!%p97_p4) target bundleno = 25 (0x19), region = 40  ;;  %s235_s10 = sand.u32 (%p97_p4), 1, %s998_s25  }
  0x12   : > { %s835_s11 = sshll.u32 (%p97_p4), %s1002_s26, 3  ;;  %s834_s12 = sshll.u32 (%p97_p4), %s235_s10, 6 }
  0x13   : > { %s239_s15 = scalar_lea.vmem (%p97_p4), %s1199_s3, %s835_s11  ;;  %s237_s16 = scalar_lea.vmem (%p97_p4), [#allocation2], %s834_s12 }
  0x14   : > { %v281_v0 = vld [vmem:[%s239_s15] sm:$0xff] (%p97_p4)  ;;  %v283_v1 = vld [vmem:[%s239_s15 + $0x10] sm:$0xff] (%p97_p4) }
  0x15   : > { %v285_v2 = vld [vmem:[%s239_s15 + $0x20] sm:$0xff] (%p97_p4)  ;;  %282 = vst [vmem:[%s237_s16] sm:$0xff] (%p97_p4), %v281_v0  ;;  %284 = vst [vmem:[%s237_s16 + $0x8] sm:$0xff] (%p97_p4), %v283_v1  ;;  %v287_v3 = vld [vmem:[%s239_s15 + $0x30] sm:$0xff] (%p97_p4) }
  0x16   : > { %286 = vst [vmem:[%s237_s16 + $0x10] sm:$0xff] (%p97_p4), %v285_v2  ;;  %v289_v4 = vld [vmem:[%s239_s15 + $0x40] sm:$0xff] (%p97_p4)  ;;  %v291_v5 = vld [vmem:[%s239_s15 + $0x50] sm:$0xff] (%p97_p4)  ;;  %288 = vst [vmem:[%s237_s16 + $0x18] sm:$0xff] (%p97_p4), %v287_v3 }
  0x17   : > { %290 = vst [vmem:[%s237_s16 + $0x20] sm:$0xff] (%p97_p4), %v289_v4  ;;  %292 = vst [vmem:[%s237_s16 + $0x28] sm:$0xff] (%p97_p4), %v291_v5  ;;  %v293_v6 = vld [vmem:[%s239_s15 + $0x60] sm:$0xff] (%p97_p4)  ;;  %v295_v7 = vld [vmem:[%s239_s15 + $0x70] sm:$0xff] (%p97_p4) }
  0x18   : > { %294 = vst [vmem:[%s237_s16 + $0x30] sm:$0xff] %v293_v6  ;;  %296 = vst [vmem:[%s237_s16 + $0x38] sm:$0xff] %v295_v7 }
  0x19 PF: > { %p836_p7 = scmp.ge.s32.totalorder %s1002_s26, 1  ;;  %p301_p8 = scmp.lt.s32.totalorder %s1002_s26, 3 }
  0x1b   : > { %p302_p9 = pnand %p836_p7, %p301_p8 }
  0x1c   : > { %s308_s17 = sand.u32 (!%p302_p9), 1, %s994_s24   ;;  %v347_v8 = vld [vmem:[%s1197_s1] sm:$0xff] (!%p302_p9)  ;;  %v348_v9 = vld [vmem:[%s1197_s1 + $0x8] sm:$0xff] (!%p302_p9)  ;;  %vm358_vm0 = vcmask (!%p302_p9), 261120   ;;  %v1004_v11 = vmov (!%p302_p9), 0.0|0.0   ;;  %vm1005_vm2 = vmmov (!%p302_p9), 0  }
  0x1d   : > { %305 = sbr.rel (%p302_p9) target bundleno = 278 (0x116), region = 78  ;;  %v446_v10 = vld [vmem:[%s1200_s4] sm:$0xff] (!%p302_p9)  ;;  %s1101_s29 = sshll.u32 (!%p302_p9), %s308_s17, 6  ;;  %926 = vmatprep.subr.bf16.mxu0 (!%p302_p9), %v1004_v11  ;;  %v927_v12 = vpack.c.bf16 (!%p302_p9), %v348_v9, %v347_v8  ;;  %vm1105_vm1 = vmpackc.low (!%p302_p9), %vm358_vm0, %vm358_vm0  ;;  %v1006_v14 = vmov (!%p302_p9), 0.0   ;;  %v1007_v15 = vmov (!%p302_p9), 0   ;;  %v349_v21 = vld [vmem:[%s1197_s1 + $0x10] sm:$0xff] (!%p302_p9) }
  0x1e   : > { %906 = vmatprep.mubr.msk.f32.mxu1 (!%p302_p9), %vm358_vm0, %v446_v10  ;;  %895 = vmatprep.mubr.msk.f32.mxu0 (!%p302_p9), %vm1005_vm2, %v1006_v14  ;;  %s310_s24 = scalar_lea.vmem (!%p302_p9), [#allocation2], %s1101_s29  ;;  %v350_v22 = vld [vmem:[%s1197_s1 + $0x18] sm:$0xff] (!%p302_p9)  ;;  %v450_v26 = vld [vmem:[%s1201_s5] sm:$0xff] (!%p302_p9)  ;;  %v452_v27 = vld [vmem:[%s1201_s5 + $0x10] sm:$0xff] (!%p302_p9)  ;;  %p342_p10 = scmp.lt.s32.totalorder (!%p302_p9), %s1064_s27, 1  ;;  %vm444_vm3 = vcmask (!%p302_p9), 254976  }
  0x1f   : > { %978 = vset.pattern.permute.xlu0 (!%p302_p9), %v1007_v15  ;;  %v454_v16 = vld [vmem:[%s310_s24] sm:$0xff] (!%p302_p9)  ;;  %v455_v17 = vld [vmem:[%s310_s24 + $0x8] sm:$0xff] (!%p302_p9)  ;;  %v456_v18 = vld [vmem:[%s310_s24 + $0x10] sm:$0xff] (!%p302_p9)  ;;  %929 = vmatpush3.bf16.xpose.msk.msra.mxu0 (!%p302_p9), %vm1105_vm1, %v927_v12  ;;  %v931_v28 = vpack.c.bf16 (!%p302_p9), %v350_v22, %v349_v21  ;;  %s1159_s15 = scalar_lea.vmem (!%p302_p9), [#allocation3], %s1101_s29 }
  0x20   : > { %979 = vset.pattern.permute.xlu1 (!%p302_p9), %v1007_v15  ;;  %v934_v19 = vpack.c.bf16 (!%p302_p9), %v455_v17, %v454_v16  ;;  %v457_v20 = vld [vmem:[%s310_s24 + $0x18] sm:$0xff] (!%p302_p9)  ;;  %930 = vmatprep.subr.bf16.mxu0 (!%p302_p9), %v1004_v11  ;;  %v850_v24 = vld [vmem:[%s310_s24 + $0x20] sm:$0xff] (!%p302_p9)  ;;  %v851_v25 = vld [vmem:[%s310_s24 + $0x28] sm:$0xff] (!%p302_p9) }
  0x21   : > { %v938_v23 = vpack.c.bf16 (!%p302_p9), %v457_v20, %v456_v18  ;;  %460 = vperm.xlu0 (!%p302_p9), %978, %v450_v26   ;;  %v942_v29 = vpack.c.bf16 (!%p302_p9), %v851_v25, %v850_v24  ;;  %470 = vperm.xlu1 (!%p302_p9), %979, %v452_v27   ;;  %v852_v30 = vld [vmem:[%s310_s24 + $0x30] sm:$0xff] (!%p302_p9)  ;;  %v853_v31 = vld [vmem:[%s310_s24 + $0x38] sm:$0xff] (!%p302_p9)  ;;  %v451_v32 = vld [vmem:[%s1201_s5 + $0x8] sm:$0xff] (!%p302_p9) }
  0x22   : > { %935 = vmatprep.subr.bf16.mxu1 (!%p302_p9), %v934_v19  ;;  %v453_v33 = vld [vmem:[%s1201_s5 + $0x18] sm:$0xff] (!%p302_p9)  ;;  %v447_v34 = vld [vmem:[%s1200_s4 + $0x8] sm:$0xff] (!%p302_p9)  ;;  %v448_v35 = vld [vmem:[%s1200_s4 + $0x10] sm:$0xff] (!%p302_p9)  ;;  %v946_v36 = vpack.c.bf16 (!%p302_p9), %v853_v31, %v852_v30 }
  0x23   : > { %937 = vmatpush3.bf16.msra.mxu1 (!%p302_p9), %v934_v19  ;;  %v449_v37 = vld [vmem:[%s1200_s4 + $0x18] sm:$0xff] (!%p302_p9)  ;;  %v346_v38 = vld [vmem:[%s1196_s0] sm:$0x3] (!%p302_p9) }
  0x24   : > { %939 = vmatprep.subr.bf16.mxu1 %v938_v23  ;;  %s343_s11 = scalar_select %p342_p10, %s1064_s27, 1  ;;  %v840_v47 = vld [vmem:[%s1198_s2] ss:$0 sm:$0xff] }
  0x25   : > { %465 = vperm.xlu0 %978, %v451_v32   ;;  %475 = vperm.xlu1 %979, %v453_v33   ;;  %s863_s29 = sshll.u32 (%p1079_p5), %s1064_s27, 3 }
  0x26   : > { %s839_s12 = sshll.u32 %s343_s11, 1  ;;  %s689_s21 = scalar_lea.vmem (%p1079_p5), %s1203_s7, %s863_s29 }
  0x27   : > { %941 = vmatpush3.bf16.msra.mxu1 %v938_v23  ;;  %933 = vmatpush3.bf16.xpose.msk.msra.mxu0 %vm1105_vm1, %v931_v28  ;;  %s345_s18 = scalar_lea.vmem %s1202_s6, %s839_s12 }
  0x28   : > { %943 = vmatprep.subr.bf16.mxu1 %v942_v29 }
  0x2a   : > { %907 = vmatmul.mubr.msk.f32.vlgmr.msra.gmra.mrb[0].mxu1 %vm358_vm0, %v447_v34 }
  0x2b   : > { %945 = vmatpush3.bf16.msra.mxu1 %v942_v29  ;;  %909 = vmatprep.mubr.msk.f32.mxu1 %vm358_vm0, %v448_v35 }
  0x2c   : > { %947 = vmatprep.subr.bf16.mxu1 %v946_v36 }
  0x2e   : > { %910 = vmatmul.mubr.msk.f32.gmra.mrb[2].mxu1 %vm358_vm0, %v449_v37  ;;  %896 = vmatmul.mubr.msk.f32.vlgmr.msra.gmra.mrb[0].mxu0 %vm358_vm0, %v346_v38 }
  0x2f   : > { %949 = vmatpush3.bf16.msra.mxu1 %v946_v36  ;;  %920 = vmatprep.mubr.msk.f32.mxu1 %vm358_vm0, %v446_v10 }
  0x32   : > { %921 = vmatmul.mubr.msk.f32.vlgmr.msra.gmra.mrb[4].mxu1 %vm358_vm0, %v447_v34 }
  0x33   : > { %923 = vmatprep.mubr.msk.f32.mxu1 %vm358_vm0, %v448_v35 }
  0x36   : > { %924 = vmatmul.mubr.msk.f32.gmra.mrb[6].mxu1 %vm358_vm0, %v449_v37 }
  0xa0   : > { %v461_v39 = vpop.permute.xlu0 %460  ;;  %v471_v40 = vpop.permute.xlu1 %470 }
  0xa4   : > { %v466_v41 = vpop.permute.xlu0 %465  ;;  %v476_v46 = vpop.permute.xlu1 %475 }
  0xfd   : > { %v908_v42 = vpop.f32.mrb[0].mxu1 }
  0xfe   : > { %v562_v43 = vadd.f32 %v908_v42, %v466_v41  ;;  %v556_v44 = vpop.f32.mrb[1].mxu1 }
  0xff   : > { %v557_v45 = vadd.f32 %v556_v44, %v461_v39 }
 0x100   : > { %576 = vst [vmem:[%s1159_s15 + $0x8] sm:$0xff] %v562_v43 }
 0x101   : > { %575 = vst [vmem:[%s1159_s15] sm:$0xff] %v557_v45  ;;  %v911_v48 = vpop.f32.mrb[2].mxu1  ;;  %v440_v49 = vpop.f32.mrb[0].mxu0 }
 0x102   : > { %v572_v50 = vadd.f32 %v911_v48, %v476_v46  ;;  %v566_v51 = vpop.f32.mrb[3].mxu1  ;;  %v441_v52 = vadd.f32 %v840_v47, %v440_v49  ;;  %v897_v53 = vpop.f32.mrb[1].mxu0 }
 0x103   : > { %v567_v54 = vadd.f32 %v566_v51, %v471_v40 }
 0x104   : > { %578 = vst [vmem:[%s1159_s15 + $0x18] sm:$0xff] %v572_v50  ;;  %445 = vst.msk [vmem:[%s345_s18] sm:$0x3] %vm444_vm3, %v441_v52 }
 0x105   : > { %577 = vst [vmem:[%s1159_s15 + $0x10] sm:$0xff] %v567_v54  ;;  %v922_v55 = vpop.f32.mrb[4].mxu1 }
 0x106   : > { %v656_v56 = vadd.f32 %v922_v55, %v466_v41  ;;  %v650_v57 = vpop.f32.mrb[5].mxu1 }
 0x107   : > { %v651_v58 = vadd.f32 %v650_v57, %v461_v39  ;;  %687 = sbr.rel (!%p1079_p5) target bundleno = 278 (0x116), region = 90  ;;  %v733_v0 = vld [vmem:[%s1159_s15 + $0x8] sm:$0xff] (%p1079_p5) }
 0x108   : > { %859 = vst [vmem:[%s1159_s15 + $0x28] sm:$0xff] %v656_v56  ;;  %v731_v63 = vld [vmem:[%s1159_s15] sm:$0xff] (%p1079_p5)  ;;  %734 = vst [vmem:[%s689_s21 + $0x10] sm:$0xff] (%p1079_p5), %v733_v0 }
 0x109   : > { %858 = vst [vmem:[%s1159_s15 + $0x20] sm:$0xff] %v651_v58  ;;  %v925_v59 = vpop.f32.mrb[6].mxu1  ;;  %732 = vst [vmem:[%s689_s21] sm:$0xff] (%p1079_p5), %v731_v63 }
 0x10a   : > { %v666_v60 = vadd.f32 %v925_v59, %v476_v46  ;;  %v660_v61 = vpop.f32.mrb[7].mxu1 }
 0x10b   : > { %v661_v62 = vadd.f32 %v660_v61, %v471_v40  ;;  %v737_v2 = vld [vmem:[%s1159_s15 + $0x18] sm:$0xff] (%p1079_p5) }
 0x10c   : > { %861 = vst [vmem:[%s1159_s15 + $0x38] sm:$0xff] %v666_v60  ;;  %v735_v1 = vld [vmem:[%s1159_s15 + $0x10] sm:$0xff] (%p1079_p5)  ;;  %738 = vst [vmem:[%s689_s21 + $0x30] sm:$0xff] (%p1079_p5), %v737_v2 }
 0x10d   : > { %860 = vst [vmem:[%s1159_s15 + $0x30] sm:$0xff] %v661_v62  ;;  %736 = vst [vmem:[%s689_s21 + $0x20] sm:$0xff] (%p1079_p5), %v735_v1 }
 0x10f   : > { %v741_v4 = vld [vmem:[%s1159_s15 + $0x28] sm:$0xff] }
 0x110   : > { %v739_v3 = vld [vmem:[%s1159_s15 + $0x20] sm:$0xff]  ;;  %742 = vst [vmem:[%s689_s21 + $0x50] sm:$0xff] %v741_v4 }
 0x111   : > { %740 = vst [vmem:[%s689_s21 + $0x40] sm:$0xff] %v739_v3 }
 0x113   : > { %v745_v6 = vld [vmem:[%s1159_s15 + $0x38] sm:$0xff] }
 0x114   : > { %v743_v5 = vld [vmem:[%s1159_s15 + $0x30] sm:$0xff]  ;;  %746 = vst [vmem:[%s689_s21 + $0x70] sm:$0xff] %v745_v6 }
 0x115   : > { %744 = vst [vmem:[%s689_s21 + $0x60] sm:$0xff] %v743_v5 }
 0x116 PF: > { %p15_p11 = scmp.ge.s32.totalorder %s1067_s28, 4   ;;  %s1207_s24 = smov %s998_s25 }
 0x117   : > { %s1208_s25 = smov %s1077_s8  ;;  %s1209_s26 = smov %s1067_s28 }
 0x118   :  { %17 = sbr.rel (!%p15_p11) target bundleno = 2 (0x2), region = 169 }

</bundles_post_ra>
